<compile_context>
chip_gen: v7x
topology: tpu7x:2x2x1
jax: 0.10.0
libtpu: 0.0.40
codegen_flags: <defaults>
</compile_context>

<pallas_src>
import jax
import jax.numpy as jnp
from jax.experimental import pallas as pl
from jax.experimental.pallas import tpu as pltpu


def _make_kernel(n_valid, tile_rows, gamma):
    gamma = float(gamma)

    def kernel(x_ref, tgt_ref, alpha_ref, out_ref):
        i = pl.program_id(0)
        x = x_ref[...].astype(jnp.float32)            # (TM, C)
        tm, c = x.shape

        # log-sum-exp pieces (no (N,C)-wide reciprocal/normalize pass)
        m = jnp.max(x, axis=1, keepdims=True)         # (TM, 1)  XLU reduce
        e = jnp.exp(x - m)                            # (TM, C)  EUP
        denom = jnp.sum(e, axis=1, keepdims=True)     # (TM, 1)  XLU reduce

        # one-hot gather of logit[class] and alpha[class] with a shared mask
        # (targets kept as a tiny (TM,1) VMEM column: the one-hot compare needs
        #  a vector, and its DMA cost is <1% of the logits tile)
        tgt = tgt_ref[...]                            # (TM, 1) int32
        col = jax.lax.broadcasted_iota(jnp.int32, (tm, c), 1)
        mask = (col == tgt).astype(jnp.float32)       # (TM, C)
        x_t = jnp.sum(x * mask, axis=1, keepdims=True)
        alpha_t = jnp.sum(alpha_ref[...] * mask, axis=1, keepdims=True)

        # log softmax(x)[class] directly (numerically stable, never -inf)
        log_p = (x_t - m) - jnp.log(denom)            # (TM, 1)
        p_t = jnp.exp(log_p)
        one_minus = 1.0 - p_t
        if gamma == 2.0:
            focal = one_minus * one_minus             # two VALU muls, no EUP
        else:
            focal = jnp.power(one_minus, gamma)
        row_loss = -alpha_t * focal * log_p           # (TM, 1)

        # zero out padded tail rows (last tile when N % TM != 0)
        row_id = i * tile_rows + jax.lax.broadcasted_iota(jnp.int32, (tm, 1), 0)
        row_loss = jnp.where(row_id < n_valid, row_loss, 0.0)

        # per-tile partial sum -> own output block (enables "parallel" grid)
        partial = jnp.sum(row_loss)
        out_ref[...] = jnp.full(out_ref.shape, partial, dtype=out_ref.dtype)

    return kernel


def focal_loss(inputs, targets, alpha, *, gamma=2.0, size_average=True,
               max_block_rows=1024):
    """inputs: (N, C) logits (f32 or bf16); targets: (N,) int; alpha: (C,) f32."""
    n, c = inputs.shape

    # Adaptive row-tile: keep each (double-buffered) logits tile around <= 2 MiB
    # so it fits comfortably in v7x's 32 MiB scoped VMEM with pipeline buffers.
    bytes_per_row = c * jnp.dtype(inputs.dtype).itemsize
    tm = max(8, min(max_block_rows, (2 * 1024 * 1024) // max(1, bytes_per_row)))
    tm = min(tm, ((n + 7) // 8) * 8)      # don't tile beyond the (8-padded) batch
    tm = max(8, (tm // 8) * 8)            # sublane-aligned

    num_tiles = pl.cdiv(n, tm)
    n_pad = num_tiles * tm

    x = inputs                             # keep native dtype (bf16 passes through)
    tgt = targets.astype(jnp.int32).reshape(n, 1)
    if n_pad != n:
        x = jnp.pad(x, ((0, n_pad - n), (0, 0)))
        tgt = jnp.pad(tgt, ((0, n_pad - n), (0, 0)))
    alpha2d = jnp.asarray(alpha, jnp.float32).reshape(1, c)

    partials = pl.pallas_call(
        _make_kernel(n, tm, gamma),
        out_shape=jax.ShapeDtypeStruct((num_tiles, 8, 128), jnp.float32),
        grid=(num_tiles,),
        in_specs=[
            pl.BlockSpec((tm, c), lambda i: (i, 0)),   # logits tile
            pl.BlockSpec((tm, 1), lambda i: (i, 0)),   # targets column
            pl.BlockSpec((1, c), lambda i: (0, 0)),    # alpha (resident)
        ],
        out_specs=pl.BlockSpec((1, 8, 128), lambda i: (i, 0, 0)),
        compiler_params=pltpu.CompilerParams(
            dimension_semantics=("parallel",)),
    )(x, tgt, alpha2d)

    # Final reduction + global mean in plain JAX (single division by global N).
    total = jnp.sum(partials[:, 0, 0])
    if size_average:
        total = total / jnp.float32(n)
    return total


def focal_loss_ref(inputs, targets, alpha, gamma=2.0, size_average=True):
    # pure-JAX reference mirroring the PyTorch forward
    p = jax.nn.softmax(inputs.astype(jnp.float32), axis=1)
    probs = jnp.take_along_axis(p, targets[:, None], axis=1)[:, 0]
    alpha_t = jnp.asarray(alpha, jnp.float32)[targets]
    batch_loss = -alpha_t * (1.0 - probs) ** gamma * jnp.log(probs)
    return jnp.mean(batch_loss) if size_average else jnp.sum(batch_loss)


if __name__ == "__main__":
    key = jax.random.PRNGKey(0)
    k1, k2 = jax.random.split(key)

    N, C = 20, 16  # N not a multiple of 8 -> exercises the tail-row mask
    inputs = jax.random.normal(k1, (N, C), dtype=jnp.float32)
    targets = jax.random.randint(k2, (N,), 0, C, dtype=jnp.int32)
    # FocalLoss(class_num=C, alpha=None) -> alpha = ones(class_num)
    alpha = jnp.ones((C,), dtype=jnp.float32)

    ref = focal_loss_ref(inputs, targets, alpha)

    # default (single-tile) path
    loss = focal_loss(inputs, targets, alpha)
    jax.block_until_ready(loss)
    assert jnp.allclose(loss, ref, rtol=1e-5, atol=1e-5), (loss, ref)

    # multi-tile path: 3 grid steps incl. a padded tail tile
    loss_mt = focal_loss(inputs, targets, alpha, max_block_rows=8)
    jax.block_until_ready(loss_mt)
    assert jnp.allclose(loss_mt, ref, rtol=1e-5, atol=1e-5), (loss_mt, ref)

    # size_average=False (sum reduction)
    loss_sum = focal_loss(inputs, targets, alpha, size_average=False)
    ref_sum = focal_loss_ref(inputs, targets, alpha, size_average=False)
    jax.block_until_ready(loss_sum)
    assert jnp.allclose(loss_sum, ref_sum, rtol=1e-5, atol=1e-5), (loss_sum, ref_sum)

    print("KERNEL_OK")
</pallas_src>

<mosaic_0001>
module attributes {stable_mosaic.version = 11 : i64} {
  func.func @kernel(%arg0: i32, %arg1: memref<24x16xf32, #tpu.memory_space<vmem>>, %arg2: memref<24x1xi32, #tpu.memory_space<vmem>>, %arg3: memref<1x16xf32, #tpu.memory_space<vmem>>, %arg4: memref<1x8x128xf32, #tpu.memory_space<vmem>>) attributes {dimension_semantics = [#tpu.dimension_semantics<parallel>], iteration_bounds = array<i64: 1>, scalar_prefetch = 0 : i64, scratch_operands = 0 : i64, tpu.core_type = #tpu.core_type<tc>, window_params = [{transform_indices = @transform_0, window_bounds = array<i64: 24, 16>}, {transform_indices = @transform_1, window_bounds = array<i64: 24, 1>}, {pipeline_mode = #tpu.pipeline_mode<synchronous>, transform_indices = @transform_2, window_bounds = array<i64: 1, 16>}, {transform_indices = @transform_3, window_bounds = array<i64: 1, 8, 128>}]} {
    %c0 = arith.constant 0 : index
    %c0_0 = arith.constant 0 : index
    %0 = vector.load %arg1[%c0, %c0_0] : memref<24x16xf32, #tpu.memory_space<vmem>>, vector<24x16xf32>
    %cst = arith.constant dense<0xFF800000> : vector<24xf32>
    %1 = vector.multi_reduction <maximumf>, %0, %cst [1] : vector<24x16xf32> to vector<24xf32>
    %2 = vector.shape_cast %1 : vector<24xf32> to vector<24x1xf32>
    %3 = vector.broadcast %2 : vector<24x1xf32> to vector<24x16xf32>
    %4 = arith.subf %0, %3 : vector<24x16xf32>
    %5 = math.exp %4 : vector<24x16xf32>
    %cst_1 = arith.constant dense<0.000000e+00> : vector<24xf32>
    %6 = vector.multi_reduction <add>, %5, %cst_1 [1] : vector<24x16xf32> to vector<24xf32>
    %7 = vector.shape_cast %6 : vector<24xf32> to vector<24x1xf32>
    %c0_2 = arith.constant 0 : index
    %c0_3 = arith.constant 0 : index
    %8 = vector.load %arg2[%c0_2, %c0_3] : memref<24x1xi32, #tpu.memory_space<vmem>>, vector<24x1xi32>
    %9 = tpu.iota {dimensions = array<i32: 1>} : vector<24x16xi32>
    %10 = vector.broadcast %8 : vector<24x1xi32> to vector<24x16xi32>
    %11 = arith.cmpi eq, %9, %10 : vector<24x16xi32>
    %12 = arith.extui %11 : vector<24x16xi1> to vector<24x16xi32>
    %13 = arith.sitofp %12 : vector<24x16xi32> to vector<24x16xf32>
    %14 = arith.mulf %0, %13 : vector<24x16xf32>
    %cst_4 = arith.constant dense<0.000000e+00> : vector<24xf32>
    %15 = vector.multi_reduction <add>, %14, %cst_4 [1] : vector<24x16xf32> to vector<24xf32>
    %16 = vector.shape_cast %15 : vector<24xf32> to vector<24x1xf32>
    %c0_5 = arith.constant 0 : index
    %c0_6 = arith.constant 0 : index
    %17 = vector.load %arg3[%c0_5, %c0_6] : memref<1x16xf32, #tpu.memory_space<vmem>>, vector<1x16xf32>
    %18 = vector.broadcast %17 : vector<1x16xf32> to vector<24x16xf32>
    %19 = arith.mulf %18, %13 : vector<24x16xf32>
    %cst_7 = arith.constant dense<0.000000e+00> : vector<24xf32>
    %20 = vector.multi_reduction <add>, %19, %cst_7 [1] : vector<24x16xf32> to vector<24xf32>
    %21 = vector.shape_cast %20 : vector<24xf32> to vector<24x1xf32>
    %22 = arith.subf %16, %2 : vector<24x1xf32>
    %23 = math.log %7 : vector<24x1xf32>
    %24 = arith.subf %22, %23 : vector<24x1xf32>
    %25 = math.exp %24 : vector<24x1xf32>
    %cst_8 = arith.constant 1.000000e+00 : f32
    %26 = vector.broadcast %cst_8 : f32 to vector<24x1xf32>
    %27 = arith.subf %26, %25 : vector<24x1xf32>
    %28 = arith.mulf %27, %27 : vector<24x1xf32>
    %cst_9 = arith.constant 0.000000e+00 : f32
    %29 = vector.broadcast %cst_9 : f32 to vector<24x1xf32>
    %30 = arith.subf %29, %21 : vector<24x1xf32>
    %31 = arith.mulf %30, %28 : vector<24x1xf32>
    %32 = arith.mulf %31, %24 : vector<24x1xf32>
    %c24_i32 = arith.constant 24 : i32
    %33 = arith.muli %arg0, %c24_i32 : i32
    %34 = tpu.iota {dimensions = array<i32: 0>} : vector<24x1xi32>
    %35 = vector.broadcast %33 : i32 to vector<24x1xi32>
    %36 = arith.addi %35, %34 : vector<24x1xi32>
    %c20_i32 = arith.constant 20 : i32
    %37 = vector.broadcast %c20_i32 : i32 to vector<24x1xi32>
    %38 = arith.cmpi slt, %36, %37 : vector<24x1xi32>
    %cst_10 = arith.constant 0.000000e+00 : f32
    %39 = vector.broadcast %cst_10 : f32 to vector<24x1xf32>
    %40 = arith.select %38, %32, %39 : vector<24x1xi1>, vector<24x1xf32>
    %41 = vector.shape_cast %40 : vector<24x1xf32> to vector<1x24x1xf32>
    %cst_11 = arith.constant dense<0.000000e+00> : vector<1xf32>
    %42 = vector.multi_reduction <add>, %41, %cst_11 [1, 2] : vector<1x24x1xf32> to vector<1xf32>
    %43 = vector.shape_cast %42 : vector<1xf32> to vector<1x1x1xf32>
    %44 = vector.extract %43[0, 0, 0] : f32 from vector<1x1x1xf32>
    %45 = vector.broadcast %44 : f32 to vector<1x8x128xf32>
    %c0_12 = arith.constant 0 : index
    %c0_13 = arith.constant 0 : index
    %c0_14 = arith.constant 0 : index
    %46 = vector.load %arg4[%c0_12, %c0_13, %c0_14] : memref<1x8x128xf32, #tpu.memory_space<vmem>>, vector<1x8x128xf32>
    tpu.vector_store %arg4[%c0_12, %c0_13, %c0_14], %45 {strides = array<i32>} : memref<1x8x128xf32, #tpu.memory_space<vmem>>, vector<1x8x128xf32>,
    return
  }
  func.func @transform_0(%arg0: i32) -> (i32, i32) {
    %c0_i32 = arith.constant 0 : i32
    %c0_i32_0 = arith.constant 0 : i32
    return %arg0, %c0_i32 : i32, i32
  }
  func.func @transform_1(%arg0: i32) -> (i32, i32) {
    %c0_i32 = arith.constant 0 : i32
    %c0_i32_0 = arith.constant 0 : i32
    return %arg0, %c0_i32 : i32, i32
  }
  func.func @transform_2(%arg0: i32) -> (i32, i32) {
    %c0_i32 = arith.constant 0 : i32
    %c0_i32_0 = arith.constant 0 : i32
    %c0_i32_1 = arith.constant 0 : i32
    return %c0_i32, %c0_i32_0 : i32, i32
  }
  func.func @transform_3(%arg0: i32) -> (i32, i32, i32) {
    %c0_i32 = arith.constant 0 : i32
    %c0_i32_0 = arith.constant 0 : i32
    %c0_i32_1 = arith.constant 0 : i32
    return %arg0, %c0_i32, %c0_i32_0 : i32, i32, i32
  }
}

</mosaic_0001>

<bundles_post_ra>
// kernel: tpu_custom_call.1
= control target key start
LH: loop header
LB: loop body
LE: loop exit
PB: predicated region body
PF: predicated region fallthrough
CT: control target
= control target key end

     0   :  { %vm18_vm0 = vcmask 130048   ;;  %v232_v5 = vmov 0   ;;  %s314_s0 = inlined_call_operand.vmem [shape: f32[24,16], index: 0, kind: input, shape index: {}]   ;;  %s315_s1 = inlined_call_operand.vmem [shape: s32[24,1], index: 1, kind: input, shape index: {}]   ;;  %s316_s2 = inlined_call_operand.vmem [shape: f32[1,16], index: 2, kind: input, shape index: {}]   ;;  %s317_s3 = inlined_call_operand.hbm [shape: f32[1,8,128], index: 3, kind: output, shape index: {}]  }
   0x1   :  { %v15_v0 = vld [vmem:[%s314_s0] sm:$0xff]  ;;  %v17_v1 = vld [vmem:[%s314_s0 + $0x10] sm:$0xff]  ;;  %v16_v2 = vld [vmem:[%s314_s0 + $0x8] sm:$0xff]  ;;  %188 = vset.pattern.permute.xlu1 %v232_v5  ;;  %189 = vset.pattern.permute.xlu0 %v232_v5 }
   0x2   :  { %v19_v3 = vsel %vm18_vm0, %v15_v0, -inf  ;;  %v25_v4 = vsel %vm18_vm0, %v17_v1, -inf }
   0x3   :  { %20 = vmax.xlane.f32.xlu0 %v19_v3  ;;  %26 = vmax.xlane.f32.xlu1 %v25_v4 }
   0x4   :  { %8 = vsyncpa [#allocation3], 0  ;;  %v22_v6 = vsel %vm18_vm0, %v16_v2, -inf  ;;  %v46_v7 = vld [vmem:[%s315_s1] sm:$0xff]  ;;  %v48_v8 = vld [vmem:[%s315_s1 + $0x10] sm:$0xff]  ;;  %v49_v17 = vlaneseq  ;;  %v233_v25 = vmov 0.0  }
   0x5   :  { %v47_v9 = vld [vmem:[%s315_s1 + $0x8] sm:$0xff]  ;;  %v182_v28 = vld [vmem:[%s316_s2] ss:$0 sm:$0xff]  ;;  %vm148_vm4 = vcmask 7168   ;;  %s234_s2 = smov [#allocation2]  }
   0x6   :  { %v50_v21 = vand.u32 127, %v49_v17  ;;  %s171_s24 = sshll.u32 %s234_s2, 4  ;;  %s172_s24 = int_to_ptr.vmem [resolvable:$true] %s171_s24 }
   0x7   :  { %23 = vmax.xlane.f32.xlu0 %v22_v6  ;;  %s208_s26 = scalar_lea.vmem %s172_s24, 128  ;;  %p213_p1 = scmp.lt.s32.totalorder %s172_s24, %s172_s24 }
   0x8   :  { %p209_p0 = scmp.ne.s32.totalorder %s172_s24, %s208_s26  ;;  %p214_p2 = scmp.lt.s32.totalorder %s208_s26, %s208_s26 }
   0xa   :  { %p215_p3 = por %p214_p2, %p213_p1 }
   0xc   :  { %p216_p4 = pnand %p215_p3, %p209_p0 }
  0x14   :  { %52 = vperm.xlu1 %188, %v46_v7  }
  0x18   :  { %58 = vperm.xlu1 %188, %v48_v8  }
  0x1d   :  { %55 = vperm.xlu0 %189, %v47_v9   ;;  %v135_v9 = vshrl.u32 %v49_v17, 7 }
  0x90   :  { %v276_v10 = vpop.xlane.xlu0 %20  ;;  %v278_v11 = vpop.xlane.xlu1 %26 }
  0x91   :  { %v28_v12 = vsub.f32 %v15_v0, %v276_v10  ;;  %v30_v13 = vsub.f32 %v17_v1, %v278_v11 }
  0x93   :  { %v31_v14 = vmul.f32 1.442695, %v28_v12  ;;  %v35_v15 = vmul.f32 1.442695, %v30_v13 }
  0x94   :  { %v282_v16 = vpop.xlane.xlu0 %23  ;;  %v53_v18 = vpop.permute.xlu1 %52 }
  0x95   :  { %190 = vpow2.f32 %v31_v14  ;;  %v29_v19 = vsub.f32 %v16_v2, %v282_v16  ;;  %vm60_vm1 = vcmp.eq.s32.totalorder %v50_v21, %v53_v18 }
  0x96   :  { %192 = vpow2.f32 %v35_v15  ;;  %v179_v26 = vsel %vm60_vm1, 1.0, %v233_v25 }
  0x97   :  { %v33_v20 = vmul.f32 1.442695, %v29_v19  ;;  %v69_v32 = vmul.f32 %v179_v26, %v15_v0  ;;  %v88_v43 = vmul.f32 %v182_v28, %v179_v26 }
  0x98   :  { %v59_v22 = vpop.permute.xlu1 %58 }
  0x99   :  { %194 = vpow2.f32 %v33_v20  ;;  %vm62_vm2 = vcmp.eq.s32.totalorder %v50_v21, %v59_v22  ;;  %v72_v37 = vsel %vm18_vm0, %v69_v32, 0.0  ;;  %v91_v44 = vsel %vm18_vm0, %v88_v43, 0.0 }
  0x9a   :  { %v181_v27 = vsel %vm62_vm2, 1.0, %v233_v25  ;;  %v137_v20 = vadd.s32 16, %v135_v9 }
  0x9b   :  { %v90_v33 = vmul.f32 %v182_v28, %v181_v27  ;;  %v71_v41 = vmul.f32 %v181_v27, %v17_v1 }
  0x9c   :  { %v56_v23 = vpop.permute.xlu0 %55  ;;  %vm144_vm5 = vcmp.lt.s32.totalorder %v137_v20, 20 }
  0x9d   :  { %vm61_vm3 = vcmp.eq.s32.totalorder %v50_v21, %v56_v23  ;;  %v97_v38 = vsel %vm18_vm0, %v90_v33, 0.0  ;;  %v78_v42 = vsel %vm18_vm0, %v71_v41, 0.0 }
  0x9e   :  { %v180_v35 = vsel %vm61_vm3, 1.0, %v233_v25 }
  0x9f   :  { %v191_v24 = vpop.eup %190  ;;  %v70_v39 = vmul.f32 %v180_v35, %v16_v2  ;;  %v89_v45 = vmul.f32 %v182_v28, %v180_v35 }
  0xa0   :  { %v193_v29 = vpop.eup %192  ;;  %v37_v30 = vsel %vm18_vm0, %v191_v24, 0.0 }
  0xa1   :  { %38 = vadd.xlane.f32.xlu1 %v37_v30  ;;  %v43_v31 = vsel %vm18_vm0, %v193_v29, 0.0  ;;  %v75_v40 = vsel %vm18_vm0, %v70_v39, 0.0  ;;  %v94_v46 = vsel %vm18_vm0, %v89_v45, 0.0 }
  0xa3   :  { %v195_v34 = vpop.eup %194 }
  0xa4   :  { %v40_v36 = vsel %vm18_vm0, %v195_v34, 0.0 }
  0xa5   :  { %44 = vadd.xlane.f32.xlu1 %v43_v31  ;;  %41 = vadd.xlane.f32.xlu0 %v40_v36 }
  0xa9   :  { %73 = vadd.xlane.f32.xlu1 %v72_v37  ;;  %98 = vadd.xlane.f32.xlu0 %v97_v38 }
  0xad   :  { %76 = vadd.xlane.f32.xlu1 %v75_v40 }
  0xb1   :  { %79 = vadd.xlane.f32.xlu1 %v78_v42 }
  0xb5   :  { %92 = vadd.xlane.f32.xlu1 %v91_v44 }
  0xb9   :  { %95 = vadd.xlane.f32.xlu1 %v94_v46 }
 0x12e   :  { %v39_v47 = vpop.xlane.xlu1 %38 }
 0x12f   :  { %196 = vlog2.f32 %v39_v47 }
 0x132   :  { %v45_v48 = vpop.xlane.xlu1 %44  ;;  %v42_v49 = vpop.xlane.xlu0 %41 }
 0x133   :  { %198 = vlog2.f32 %v45_v48 }
 0x134   :  { %200 = vlog2.f32 %v42_v49 }
 0x136   :  { %v74_v50 = vpop.xlane.xlu1 %73  ;;  %v99_v14 = vpop.xlane.xlu0 %98 }
 0x137   :  { %v100_v53 = vsub.f32 %v74_v50, %v276_v10  ;;  %v126_v21 = vsub.f32 0.0, %v99_v14 }
 0x139   :  { %v197_v51 = vpop.eup %196 }
 0x13a   :  { %v104_v52 = vmul.f32 0.6931472, %v197_v51  ;;  %v77_v54 = vpop.xlane.xlu1 %76 }
 0x13b   :  { %v101_v62 = vsub.f32 %v77_v54, %v282_v16 }
 0x13c   :  { %v109_v55 = vsub.f32 %v100_v53, %v104_v52 }
 0x13d   :  { %v199_v56 = vpop.eup %198 }
 0x13e   :  { %v201_v57 = vpop.eup %200  ;;  %v108_v58 = vmul.f32 0.6931472, %v199_v56  ;;  %v112_v59 = vmul.f32 1.442695, %v109_v55  ;;  %v80_v60 = vpop.xlane.xlu1 %79 }
 0x13f   :  { %v106_v61 = vmul.f32 0.6931472, %v201_v57  ;;  %v102_v63 = vsub.f32 %v80_v60, %v278_v11 }
 0x140   :  { %202 = vpow2.f32 %v112_v59 }
 0x141   :  { %v110_v0 = vsub.f32 %v101_v62, %v106_v61  ;;  %v111_v1 = vsub.f32 %v102_v63, %v108_v58 }
 0x142   :  { %v93_v4 = vpop.xlane.xlu1 %92 }
 0x143   :  { %v114_v2 = vmul.f32 1.442695, %v110_v0  ;;  %v116_v3 = vmul.f32 1.442695, %v111_v1  ;;  %v124_v8 = vsub.f32 0.0, %v93_v4 }
 0x145   :  { %204 = vpow2.f32 %v114_v2 }
 0x146   :  { %206 = vpow2.f32 %v116_v3  ;;  %v96_v12 = vpop.xlane.xlu1 %95 }
 0x147   :  { %v125_v19 = vsub.f32 0.0, %v96_v12 }
 0x14a   :  { %v203_v5 = vpop.eup %202 }
 0x14b   :  { %v118_v6 = vsub.f32 1.0, %v203_v5 }
 0x14d   :  { %v121_v7 = vmul.f32 %v118_v6, %v118_v6 }
 0x14f   :  { %v205_v10 = vpop.eup %204  ;;  %v127_v15 = vmul.f32 %v124_v8, %v121_v7 }
 0x150   :  { %v207_v13 = vpop.eup %206  ;;  %v119_v11 = vsub.f32 1.0, %v205_v10 }
 0x151   :  { %v120_v16 = vsub.f32 1.0, %v207_v13  ;;  %v130_v23 = vmul.f32 %v127_v15, %v109_v55 }
 0x152   :  { %v122_v18 = vmul.f32 %v119_v11, %v119_v11 }
 0x153   :  { %v123_v22 = vmul.f32 %v120_v16, %v120_v16  ;;  %v149_v17 = vsel %vm148_vm4, %v130_v23, 0.0 }
 0x154   :  { %v128_v24 = vmul.f32 %v125_v19, %v122_v18 }
 0x155   :  { %v129_v25 = vmul.f32 %v126_v21, %v123_v22 }
 0x156   :  { %v131_v26 = vmul.f32 %v128_v24, %v110_v0 }
 0x157   :  { %v132_v27 = vmul.f32 %v129_v25, %v111_v1 }
 0x158   :  { %v150_v28 = vsel %vm148_vm4, %v131_v26, 0.0 }
 0x159   :  { %v147_v29 = vsel %vm144_vm5, %v132_v27, 0.0  ;;  %v151_v30 = vadd.f32 %v150_v28, %v149_v17 }
 0x15a   :  { %v152_v31 = vsel %vm148_vm4, %v147_v29, 0.0 }
 0x15b   :  { %v153_v32 = vadd.f32 %v152_v31, %v151_v30 }
 0x15d   :  { %154 = vadd.xlane.f32.xlu1 %v153_v32 }
 0x1ea   :  { %v155_v33 = vpop.xlane.xlu1 %154 }
 0x1eb   :  { %v156_v34 = vrot.slane %v155_v33, 4 }
 0x1ed   :  { %v157_v35 = vadd.f32 %v156_v34, %v155_v33 }
 0x1ef   :  { %v158_v36 = vrot.slane %v157_v35, 2 }
 0x1f1   :  { %v159_v37 = vadd.f32 %v158_v36, %v157_v35 }
 0x1f3   :  { %v160_v38 = vrot.slane %v159_v37, 1 }
 0x1f5   :  { %v161_v39 = vadd.f32 %v160_v38, %v159_v37 }
 0x1f7   :  { %183 = vpush %v161_v39 }
 0x228   :  { %s184_s25 = spop %183 }
 0x229   :  { %v163_v40 = vstv %s184_s25 }
 0x22a   :  { %164 = vst [vmem:[#allocation2] sm:$0xff] %v163_v40 }
 0x22b   :  { %219 = shalt.err (!%p216_p4)
}
 0x22c   :  { %s220_s29 = scalar_lea.hbm %s317_s3, 128 }
 0x22d   :  { %p221_p5 = scmp.ne.s32.totalorder %s317_s3, %s220_s29  ;;  %p224_p6 = scmp.lt.u32.totalorder %s220_s29, %s317_s3 }
 0x22f   :  { %p226_p7 = pnand %p224_p6, %p221_p5 }
 0x231   :  { %229 = shalt.err (!%p226_p7)
}
 0x232   :  { %174 = dma.vmem_to_hbm [thread:$0]  %s172_s24, 128, %s317_s3, [#allocation3]  }
 0x233   :  { %230 = dma.done.wait [#allocation3], 128  }
 0x234   :  { %231 = vsyncadd [#allocation3], 4294967168 }
 0x235   :  { %178 = vsyncpa [#allocation3], 1 }

</bundles_post_ra>
